<compile_context>
chip_gen: v5e
topology: v5e:2x2
jax: 0.10.0
libtpu: 0.0.40
codegen_flags: <defaults>
</compile_context>

<pallas_src>
import functools

import jax
import jax.numpy as jnp
import numpy as np
from jax.experimental import pallas as pl
from jax.experimental.pallas import tpu as pltpu

NUM_ITER = 40  # matches the module default


# ---------------------------------------------------------------------------
# Pallas kernel: full soft_skel loop on one lane-packed (H, Wl) slab
# ---------------------------------------------------------------------------
def soft_skel_kernel(img_ref, out_ref, ebuf_ref, dbuf_ref, *, num_iter, width):
    _, H, Wl = img_ref.shape
    x = img_ref[0]                      # (H, Wl) slab resident in VMEM
    dt = x.dtype

    # ---- loop-invariant constants, hoisted out of the fori_loop body ----
    col = jax.lax.broadcasted_iota(jnp.int32, (H, Wl), 1)
    if Wl != width:
        # planes packed along lanes; width is a power of two by construction
        col_in_plane = col & (width - 1)
    else:
        col_in_plane = col
    left_ok = col_in_plane >= 1                 # has in-plane left neighbor
    right_ok = col_in_plane <= width - 2        # has in-plane right neighbor
    pos_inf = jnp.full((H, Wl), jnp.inf, dtype=dt)
    neg_inf = jnp.full((H, Wl), -jnp.inf, dtype=dt)
    zeros = jnp.zeros((H, Wl), dtype=dt)
    inf_row = jnp.full((1, Wl), jnp.inf, dtype=dt)
    ninf_row = jnp.full((1, Wl), -jnp.inf, dtype=dt)

    # Halo rows (row 0 and row H+1) of the stencil scratch buffers.
    # Written once per grid step; the loop only ever rewrites rows 1..H.
    ebuf_ref[0:1, :] = inf_row
    ebuf_ref[H + 1:H + 2, :] = inf_row
    dbuf_ref[0:1, :] = ninf_row
    dbuf_ref[H + 1:H + 2, :] = ninf_row

    def left_neighbor(v):     # result[:, j] = v[:, j - 1]   (wrap is masked)
        return pltpu.roll(v, 1, 1)

    def right_neighbor(v):    # result[:, j] = v[:, j + 1]   (wrap is masked)
        return pltpu.roll(v, Wl - 1, 1)

    def erode(v):
        # vertical 3-min via halo-padded sublane-offset loads (no roll/mask)
        ebuf_ref[1:H + 1, :] = v
        vert = jnp.minimum(
            jnp.minimum(ebuf_ref[0:H, :], ebuf_ref[2:H + 2, :]), v)
        # horizontal 3-min via lane rolls + hoisted per-plane boundary masks
        horiz = jnp.minimum(
            jnp.minimum(jnp.where(left_ok, left_neighbor(v), pos_inf),
                        jnp.where(right_ok, right_neighbor(v), pos_inf)),
            v)
        return jnp.minimum(vert, horiz)

    def dilate(v):
        dbuf_ref[1:H + 1, :] = v
        vert = jnp.maximum(
            jnp.maximum(dbuf_ref[0:H, :], dbuf_ref[2:H + 2, :]), v)
        return jnp.maximum(
            jnp.maximum(jnp.where(left_ok, left_neighbor(vert), neg_inf),
                        jnp.where(right_ok, right_neighbor(vert), neg_inf)),
            vert)

    relu = lambda v: jnp.maximum(v, zeros)

    # skel = relu(img - soft_open(img))
    skel0 = relu(x - dilate(erode(x)))

    def body(_, carry):
        img, skel = carry
        img = erode(img)
        opened = dilate(erode(img))          # soft_open(img)
        delta = relu(img - opened)
        skel = skel + relu(delta - skel * delta)
        return (img, skel)

    _, skel = jax.lax.fori_loop(0, num_iter, body, (x, skel0))
    out_ref[0] = skel


# ---------------------------------------------------------------------------
# Wrapper: lane-dense packing + pallas_call
# ---------------------------------------------------------------------------
@functools.partial(jax.jit, static_argnames=("num_iter",))
def tool_skeletonize(img, num_iter=NUM_ITER):
    """JAX/Pallas equivalent of ToolSkeletonize(num_iter).forward(img), NCHW."""
    N, C, H, W = img.shape
    P = N * C
    x = img.reshape(P, H, W)

    LANE = 128
    # Pack G planes side-by-side along the lane axis when W is small.
    # (Restricted to power-of-two W so the per-plane column index is col & (W-1).)
    if W < LANE and (W & (W - 1)) == 0:
        G = max(1, min(P, (4 * LANE) // W))
    else:
        G = 1

    Pp = -(-P // G)                     # number of packed slabs
    P_pad = Pp * G
    if P_pad != P:
        x = jnp.concatenate(
            [x, jnp.zeros((P_pad - P, H, W), x.dtype)], axis=0)
    Wl = G * W
    # packed[pg, h, g*W + w] = x[pg*G + g, h, w]
    xp = x.reshape(Pp, G, H, W).transpose(0, 2, 1, 3).reshape(Pp, H, Wl)

    kernel = functools.partial(soft_skel_kernel, num_iter=num_iter, width=W)
    out = pl.pallas_call(
        kernel,
        out_shape=jax.ShapeDtypeStruct((Pp, H, Wl), xp.dtype),
        grid_spec=pltpu.PrefetchScalarGridSpec(
            num_scalar_prefetch=0,
            grid=(Pp,),
            in_specs=[pl.BlockSpec((1, H, Wl), lambda i: (i, 0, 0))],
            out_specs=pl.BlockSpec((1, H, Wl), lambda i: (i, 0, 0)),
            scratch_shapes=[
                pltpu.VMEM((H + 2, Wl), xp.dtype),   # +inf-halo buffer (erode)
                pltpu.VMEM((H + 2, Wl), xp.dtype),   # -inf-halo buffer (dilate)
            ],
        ),
        compiler_params=pltpu.CompilerParams(
            dimension_semantics=("parallel",),
            vmem_limit_bytes=32 * 1024 * 1024,
        ),
    )(xp)

    # unpack: (Pp, H, Wl) -> (P, H, W) -> NCHW
    out = out.reshape(Pp, H, G, W).transpose(0, 2, 1, 3).reshape(P_pad, H, W)
    return out[:P].reshape(N, C, H, W)


# ---------------------------------------------------------------------------
# Pure-JAX reference (mirrors the PyTorch module with lax.reduce_window)
# ---------------------------------------------------------------------------
def _ref_soft_skel(img, num_iter):
    def maxpool(x, kh, kw, ph, pw):
        return jax.lax.reduce_window(
            x, -jnp.inf, jax.lax.max,
            (1, 1, kh, kw), (1, 1, 1, 1),
            [(0, 0), (0, 0), (ph, ph), (pw, pw)])

    def erode(x):
        p1 = -maxpool(-x, 3, 1, 1, 0)
        p2 = -maxpool(-x, 1, 3, 0, 1)
        return jnp.minimum(p1, p2)

    def dilate(x):
        return maxpool(x, 3, 3, 1, 1)

    relu = lambda z: jnp.maximum(z, 0.0)

    img1 = dilate(erode(img))
    skel = relu(img - img1)
    x = img
    for _ in range(num_iter):
        x = erode(x)
        img1 = dilate(erode(x))
        delta = relu(x - img1)
        skel = skel + relu(delta - skel * delta)
    return skel


if __name__ == "__main__":
    key = jax.random.PRNGKey(0)
    # Small NCHW input consistent with the module (soft probability map in [0,1]).
    img = jax.random.uniform(key, (2, 4, 16, 16), dtype=jnp.float32)

    out = tool_skeletonize(img, num_iter=NUM_ITER)
    out = jax.block_until_ready(out)

    ref = _ref_soft_skel(img, NUM_ITER)
    np.testing.assert_allclose(np.asarray(out), np.asarray(ref),
                               rtol=1e-6, atol=1e-6)
    print("KERNEL_OK")
</pallas_src>

<mosaic_0001>
module attributes {stable_mosaic.version = 11 : i64} {
  func.func @soft_skel_kernel(%arg0: i32, %arg1: memref<1x16x128xf32, #tpu.memory_space<vmem>>, %arg2: memref<1x16x128xf32, #tpu.memory_space<vmem>>, %arg3: memref<18x128xf32, #tpu.memory_space<vmem>>, %arg4: memref<18x128xf32, #tpu.memory_space<vmem>>) attributes {dimension_semantics = [#tpu.dimension_semantics<parallel>], iteration_bounds = array<i64: 1>, scalar_prefetch = 0 : i64, scratch_operands = 2 : i64, tpu.core_type = #tpu.core_type<tc>, window_params = [{transform_indices = @transform_0, window_bounds = array<i64: 1, 16, 128>}, {transform_indices = @transform_1, window_bounds = array<i64: 1, 16, 128>}]} {
    %c0 = arith.constant 0 : index
    %c0_0 = arith.constant 0 : index
    %c0_1 = arith.constant 0 : index
    %0 = vector.load %arg1[%c0, %c0_0, %c0_1] : memref<1x16x128xf32, #tpu.memory_space<vmem>>, vector<1x16x128xf32>
    %1 = vector.shape_cast %0 : vector<1x16x128xf32> to vector<16x128xf32>
    %2 = tpu.iota {dimensions = array<i32: 1>} : vector<16x128xi32>
    %c15_i32 = arith.constant 15 : i32
    %3 = vector.broadcast %c15_i32 : i32 to vector<16x128xi32>
    %4 = arith.andi %2, %3 : vector<16x128xi32>
    %c1_i32 = arith.constant 1 : i32
    %5 = vector.broadcast %c1_i32 : i32 to vector<16x128xi32>
    %6 = arith.cmpi sge, %4, %5 : vector<16x128xi32>
    %c14_i32 = arith.constant 14 : i32
    %7 = vector.broadcast %c14_i32 : i32 to vector<16x128xi32>
    %8 = arith.cmpi sle, %4, %7 : vector<16x128xi32>
    %cst = arith.constant 0x7F800000 : f32
    %9 = vector.broadcast %cst : f32 to vector<16x128xf32>
    %cst_2 = arith.constant 0xFF800000 : f32
    %10 = vector.broadcast %cst_2 : f32 to vector<16x128xf32>
    %cst_3 = arith.constant 0.000000e+00 : f32
    %11 = vector.broadcast %cst_3 : f32 to vector<16x128xf32>
    %cst_4 = arith.constant 0x7F800000 : f32
    %12 = vector.broadcast %cst_4 : f32 to vector<1x128xf32>
    %cst_5 = arith.constant 0xFF800000 : f32
    %13 = vector.broadcast %cst_5 : f32 to vector<1x128xf32>
    %c0_6 = arith.constant 0 : index
    %c0_7 = arith.constant 0 : index
    %14 = vector.load %arg3[%c0_6, %c0_7] : memref<18x128xf32, #tpu.memory_space<vmem>>, vector<1x128xf32>
    tpu.vector_store %arg3[%c0_6, %c0_7], %12 {strides = array<i32>} : memref<18x128xf32, #tpu.memory_space<vmem>>, vector<1x128xf32>,
    %c17 = arith.constant 17 : index
    %c0_8 = arith.constant 0 : index
    %15 = vector.load %arg3[%c17, %c0_8] : memref<18x128xf32, #tpu.memory_space<vmem>>, vector<1x128xf32>
    tpu.vector_store %arg3[%c17, %c0_8], %12 {strides = array<i32>} : memref<18x128xf32, #tpu.memory_space<vmem>>, vector<1x128xf32>,
    %c0_9 = arith.constant 0 : index
    %c0_10 = arith.constant 0 : index
    %16 = vector.load %arg4[%c0_9, %c0_10] : memref<18x128xf32, #tpu.memory_space<vmem>>, vector<1x128xf32>
    tpu.vector_store %arg4[%c0_9, %c0_10], %13 {strides = array<i32>} : memref<18x128xf32, #tpu.memory_space<vmem>>, vector<1x128xf32>,
    %c17_11 = arith.constant 17 : index
    %c0_12 = arith.constant 0 : index
    %17 = vector.load %arg4[%c17_11, %c0_12] : memref<18x128xf32, #tpu.memory_space<vmem>>, vector<1x128xf32>
    tpu.vector_store %arg4[%c17_11, %c0_12], %13 {strides = array<i32>} : memref<18x128xf32, #tpu.memory_space<vmem>>, vector<1x128xf32>,
    %c1 = arith.constant 1 : index
    %c0_13 = arith.constant 0 : index
    %18 = vector.load %arg3[%c1, %c0_13] : memref<18x128xf32, #tpu.memory_space<vmem>>, vector<16x128xf32>
    tpu.vector_store %arg3[%c1, %c0_13], %1 {strides = array<i32>} : memref<18x128xf32, #tpu.memory_space<vmem>>, vector<16x128xf32>,
    %c0_14 = arith.constant 0 : index
    %c0_15 = arith.constant 0 : index
    %19 = vector.load %arg3[%c0_14, %c0_15] : memref<18x128xf32, #tpu.memory_space<vmem>>, vector<16x128xf32>
    %c2 = arith.constant 2 : index
    %c0_16 = arith.constant 0 : index
    %20 = vector.load %arg3[%c2, %c0_16] : memref<18x128xf32, #tpu.memory_space<vmem>>, vector<16x128xf32>
    %21 = arith.minimumf %19, %20 : vector<16x128xf32>
    %22 = arith.minimumf %21, %1 : vector<16x128xf32>
    %c1_i32_17 = arith.constant 1 : i32
    %23 = tpu.dynamic_rotate %1 by %c1_i32_17 dim 1 : vector<16x128xf32>, i32 -> vector<16x128xf32>
    %24 = arith.select %6, %23, %9 : vector<16x128xi1>, vector<16x128xf32>
    %c127_i32 = arith.constant 127 : i32
    %25 = tpu.dynamic_rotate %1 by %c127_i32 dim 1 : vector<16x128xf32>, i32 -> vector<16x128xf32>
    %26 = arith.select %8, %25, %9 : vector<16x128xi1>, vector<16x128xf32>
    %27 = arith.minimumf %24, %26 : vector<16x128xf32>
    %28 = arith.minimumf %27, %1 : vector<16x128xf32>
    %29 = arith.minimumf %22, %28 : vector<16x128xf32>
    %c1_18 = arith.constant 1 : index
    %c0_19 = arith.constant 0 : index
    %30 = vector.load %arg4[%c1_18, %c0_19] : memref<18x128xf32, #tpu.memory_space<vmem>>, vector<16x128xf32>
    tpu.vector_store %arg4[%c1_18, %c0_19], %29 {strides = array<i32>} : memref<18x128xf32, #tpu.memory_space<vmem>>, vector<16x128xf32>,
    %c0_20 = arith.constant 0 : index
    %c0_21 = arith.constant 0 : index
    %31 = vector.load %arg4[%c0_20, %c0_21] : memref<18x128xf32, #tpu.memory_space<vmem>>, vector<16x128xf32>
    %c2_22 = arith.constant 2 : index
    %c0_23 = arith.constant 0 : index
    %32 = vector.load %arg4[%c2_22, %c0_23] : memref<18x128xf32, #tpu.memory_space<vmem>>, vector<16x128xf32>
    %33 = arith.maximumf %31, %32 : vector<16x128xf32>
    %34 = arith.maximumf %33, %29 : vector<16x128xf32>
    %c1_i32_24 = arith.constant 1 : i32
    %35 = tpu.dynamic_rotate %34 by %c1_i32_24 dim 1 : vector<16x128xf32>, i32 -> vector<16x128xf32>
    %36 = arith.select %6, %35, %10 : vector<16x128xi1>, vector<16x128xf32>
    %c127_i32_25 = arith.constant 127 : i32
    %37 = tpu.dynamic_rotate %34 by %c127_i32_25 dim 1 : vector<16x128xf32>, i32 -> vector<16x128xf32>
    %38 = arith.select %8, %37, %10 : vector<16x128xi1>, vector<16x128xf32>
    %39 = arith.maximumf %36, %38 : vector<16x128xf32>
    %40 = arith.maximumf %39, %34 : vector<16x128xf32>
    %41 = arith.subf %1, %40 : vector<16x128xf32>
    %42 = arith.maximumf %41, %11 : vector<16x128xf32>
    %c0_i32 = arith.constant 0 : i32
    %c40_i32 = arith.constant 40 : i32
    %43 = arith.addi %c0_i32, %c40_i32 : i32
    %c1_i32_26 = arith.constant 1 : i32
    %44:2 = scf.for %arg5 = %c0_i32 to %43 step %c1_i32_26 iter_args(%arg6 = %1, %arg7 = %42) -> (vector<16x128xf32>, vector<16x128xf32>)  : i32 {
      %c1_30 = arith.constant 1 : index
      %c0_31 = arith.constant 0 : index
      %48 = vector.load %arg3[%c1_30, %c0_31] : memref<18x128xf32, #tpu.memory_space<vmem>>, vector<16x128xf32>
      tpu.vector_store %arg3[%c1_30, %c0_31], %arg6 {strides = array<i32>} : memref<18x128xf32, #tpu.memory_space<vmem>>, vector<16x128xf32>,
      %c0_32 = arith.constant 0 : index
      %c0_33 = arith.constant 0 : index
      %49 = vector.load %arg3[%c0_32, %c0_33] : memref<18x128xf32, #tpu.memory_space<vmem>>, vector<16x128xf32>
      %c2_34 = arith.constant 2 : index
      %c0_35 = arith.constant 0 : index
      %50 = vector.load %arg3[%c2_34, %c0_35] : memref<18x128xf32, #tpu.memory_space<vmem>>, vector<16x128xf32>
      %51 = arith.minimumf %49, %50 : vector<16x128xf32>
      %52 = arith.minimumf %51, %arg6 : vector<16x128xf32>
      %c1_i32_36 = arith.constant 1 : i32
      %53 = tpu.dynamic_rotate %arg6 by %c1_i32_36 dim 1 : vector<16x128xf32>, i32 -> vector<16x128xf32>
      %54 = arith.select %6, %53, %9 : vector<16x128xi1>, vector<16x128xf32>
      %c127_i32_37 = arith.constant 127 : i32
      %55 = tpu.dynamic_rotate %arg6 by %c127_i32_37 dim 1 : vector<16x128xf32>, i32 -> vector<16x128xf32>
      %56 = arith.select %8, %55, %9 : vector<16x128xi1>, vector<16x128xf32>
      %57 = arith.minimumf %54, %56 : vector<16x128xf32>
      %58 = arith.minimumf %57, %arg6 : vector<16x128xf32>
      %59 = arith.minimumf %52, %58 : vector<16x128xf32>
      %c1_38 = arith.constant 1 : index
      %c0_39 = arith.constant 0 : index
      %60 = vector.load %arg3[%c1_38, %c0_39] : memref<18x128xf32, #tpu.memory_space<vmem>>, vector<16x128xf32>
      tpu.vector_store %arg3[%c1_38, %c0_39], %59 {strides = array<i32>} : memref<18x128xf32, #tpu.memory_space<vmem>>, vector<16x128xf32>,
      %c0_40 = arith.constant 0 : index
      %c0_41 = arith.constant 0 : index
      %61 = vector.load %arg3[%c0_40, %c0_41] : memref<18x128xf32, #tpu.memory_space<vmem>>, vector<16x128xf32>
      %c2_42 = arith.constant 2 : index
      %c0_43 = arith.constant 0 : index
      %62 = vector.load %arg3[%c2_42, %c0_43] : memref<18x128xf32, #tpu.memory_space<vmem>>, vector<16x128xf32>
      %63 = arith.minimumf %61, %62 : vector<16x128xf32>
      %64 = arith.minimumf %63, %59 : vector<16x128xf32>
      %c1_i32_44 = arith.constant 1 : i32
      %65 = tpu.dynamic_rotate %59 by %c1_i32_44 dim 1 : vector<16x128xf32>, i32 -> vector<16x128xf32>
      %66 = arith.select %6, %65, %9 : vector<16x128xi1>, vector<16x128xf32>
      %c127_i32_45 = arith.constant 127 : i32
      %67 = tpu.dynamic_rotate %59 by %c127_i32_45 dim 1 : vector<16x128xf32>, i32 -> vector<16x128xf32>
      %68 = arith.select %8, %67, %9 : vector<16x128xi1>, vector<16x128xf32>
      %69 = arith.minimumf %66, %68 : vector<16x128xf32>
      %70 = arith.minimumf %69, %59 : vector<16x128xf32>
      %71 = arith.minimumf %64, %70 : vector<16x128xf32>
      %c1_46 = arith.constant 1 : index
      %c0_47 = arith.constant 0 : index
      %72 = vector.load %arg4[%c1_46, %c0_47] : memref<18x128xf32, #tpu.memory_space<vmem>>, vector<16x128xf32>
      tpu.vector_store %arg4[%c1_46, %c0_47], %71 {strides = array<i32>} : memref<18x128xf32, #tpu.memory_space<vmem>>, vector<16x128xf32>,
      %c0_48 = arith.constant 0 : index
      %c0_49 = arith.constant 0 : index
      %73 = vector.load %arg4[%c0_48, %c0_49] : memref<18x128xf32, #tpu.memory_space<vmem>>, vector<16x128xf32>
      %c2_50 = arith.constant 2 : index
      %c0_51 = arith.constant 0 : index
      %74 = vector.load %arg4[%c2_50, %c0_51] : memref<18x128xf32, #tpu.memory_space<vmem>>, vector<16x128xf32>
      %75 = arith.maximumf %73, %74 : vector<16x128xf32>
      %76 = arith.maximumf %75, %71 : vector<16x128xf32>
      %c1_i32_52 = arith.constant 1 : i32
      %77 = tpu.dynamic_rotate %76 by %c1_i32_52 dim 1 : vector<16x128xf32>, i32 -> vector<16x128xf32>
      %78 = arith.select %6, %77, %10 : vector<16x128xi1>, vector<16x128xf32>
      %c127_i32_53 = arith.constant 127 : i32
      %79 = tpu.dynamic_rotate %76 by %c127_i32_53 dim 1 : vector<16x128xf32>, i32 -> vector<16x128xf32>
      %80 = arith.select %8, %79, %10 : vector<16x128xi1>, vector<16x128xf32>
      %81 = arith.maximumf %78, %80 : vector<16x128xf32>
      %82 = arith.maximumf %81, %76 : vector<16x128xf32>
      %83 = arith.subf %59, %82 : vector<16x128xf32>
      %84 = arith.maximumf %83, %11 : vector<16x128xf32>
      %85 = arith.mulf %arg7, %84 : vector<16x128xf32>
      %86 = arith.subf %84, %85 : vector<16x128xf32>
      %87 = arith.maximumf %86, %11 : vector<16x128xf32>
      %88 = arith.addf %arg7, %87 : vector<16x128xf32>
      scf.yield %59, %88 : vector<16x128xf32>, vector<16x128xf32>
    }
    %c0_27 = arith.constant 0 : index
    %c0_28 = arith.constant 0 : index
    %c0_29 = arith.constant 0 : index
    %45 = vector.load %arg2[%c0_27, %c0_28, %c0_29] : memref<1x16x128xf32, #tpu.memory_space<vmem>>, vector<1x16x128xf32>
    %46 = vector.shape_cast %45 : vector<1x16x128xf32> to vector<16x128xf32>
    %47 = vector.shape_cast %44#1 : vector<16x128xf32> to vector<1x16x128xf32>
    tpu.vector_store %arg2[%c0_27, %c0_28, %c0_29], %47 {strides = array<i32>} : memref<1x16x128xf32, #tpu.memory_space<vmem>>, vector<1x16x128xf32>,
    return
  }
  func.func @transform_0(%arg0: i32) -> (i32, i32, i32) {
    %c0_i32 = arith.constant 0 : i32
    %c0_i32_0 = arith.constant 0 : i32
    %c0_i32_1 = arith.constant 0 : i32
    return %arg0, %c0_i32, %c0_i32_0 : i32, i32, i32
  }
  func.func @transform_1(%arg0: i32) -> (i32, i32, i32) {
    %c0_i32 = arith.constant 0 : i32
    %c0_i32_0 = arith.constant 0 : i32
    %c0_i32_1 = arith.constant 0 : i32
    return %arg0, %c0_i32, %c0_i32_0 : i32, i32, i32
  }
}

</mosaic_0001>

<bundles_post_ra>
// kernel: tool_skeletonize.1
= control target key start
LH: loop header
LB: loop body
LE: loop exit
PB: predicated region body
PF: predicated region fallthrough
CT: control target
= control target key end

     0   :  { %s290_s8 = smov 127   ;;  %s291_s9 = smov 1   ;;  %v292_v2 = vmov inf   ;;  %v293_v3 = vmov -inf   ;;  %v10_v4 = vlaneseq  ;;  %s458_s0 = inlined_call_operand.vmem [shape: f32[1,16,128], index: 0, kind: input, shape index: {}]   ;;  %s459_s1 = inlined_call_operand.vmem [shape: f32[1,16,128], index: 1, kind: output, shape index: {}]  }
   0x1   :  { %v309_v0 = vld [vmem:[%s458_s0] sm:$0xff]   ;;  %v319_v1 = vld [vmem:[%s458_s0 + $0x8] sm:$0xff]   ;;  %15 = vst [vmem:[#allocation2] sm:$0x1] %v292_v2  ;;  %s370_s0 = smov 0  }
   0x2   :  { %35 = vrot.lane.b32.xlu1 %v309_v0, %s290_s8  ;;  %19 = vst [vmem:[#allocation2 + $0x1] sm:$0xff] %v309_v0  ;;  %29 = vrot.lane.b32.xlu0 %v309_v0, %s291_s9  ;;  %v11_v5 = vand.u32 127, %v10_v4 }
   0x3   :  { %20 = vst [vmem:[#allocation2 + $0x9] sm:$0xff] %v319_v1 }
   0x4   :  { %16 = vst [vmem:[#allocation2 + $0x11] sm:$0x1] %v292_v2  ;;  %v12_v6 = vand.u32 15, %v11_v5 }
   0x5   :  { %18 = vst [vmem:[#allocation3 + $0x11] sm:$0x1] %v293_v3 }
   0x6   :  { %17 = vst [vmem:[#allocation3] sm:$0x1] %v293_v3  ;;  %vm326_vm0 = vcmp.le.s32.totalorder %v12_v6, 14  ;;  %vm330_vm1 = vcmp.ge.s32.totalorder %v12_v6, 1 }
   0x9   :  { %v21_v7 = vld [vmem:[#allocation2] sm:$0xff] }
   0xa   :  { %37 = vrot.lane.b32.xlu1 %v319_v1, %s290_s8  ;;  %31 = vrot.lane.b32.xlu0 %v319_v1, %s291_s9  ;;  %v23_v8 = vld [vmem:[#allocation2 + $0x2] sm:$0xff] }
   0xb   :  { %v25_v11 = vmin.f32 %v21_v7, %v23_v8  ;;  %v24_v18 = vld [vmem:[#allocation2 + $0xa] sm:$0xff] }
   0xc   :  { %v22_v19 = vld [vmem:[#allocation2 + $0x8] sm:$0xff] }
   0xd   :  { %v27_v16 = vmin.f32 %v25_v11, %v309_v0  ;;  %v26_v22 = vmin.f32 %v22_v19, %v24_v18 }
   0xf   :  { %v28_v27 = vmin.f32 %v26_v22, %v319_v1 }
  0x74   :  { %v36_v12 = vpop.permute.xlu1 %35  ;;  %v30_v13 = vpop.permute.xlu0 %29 }
  0x75   :  { %v39_v14 = vsel %vm326_vm0, %v36_v12, inf  ;;  %v33_v15 = vsel %vm330_vm1, %v30_v13, inf }
  0x76   :  { %v41_v17 = vmin.f32 %v33_v15, %v39_v14 }
  0x78   :  { %v43_v20 = vmin.f32 %v41_v17, %v309_v0 }
  0x7a   :  { %v45_v21 = vmin.f32 %v27_v16, %v43_v20 }
  0x7c   :  { %47 = vst [vmem:[#allocation3 + $0x1] sm:$0xff] %v45_v21  ;;  %v38_v23 = vpop.permute.xlu1 %37  ;;  %v32_v24 = vpop.permute.xlu0 %31 }
  0x7d   :  { %v40_v25 = vsel %vm326_vm0, %v38_v23, inf  ;;  %v34_v26 = vsel %vm330_vm1, %v32_v24, inf }
  0x7e   :  { %v42_v28 = vmin.f32 %v34_v26, %v40_v25 }
  0x80   :  { %v44_v29 = vmin.f32 %v42_v28, %v319_v1 }
  0x82   :  { %v46_v30 = vmin.f32 %v28_v27, %v44_v29 }
  0x83   :  { %v49_v31 = vld [vmem:[#allocation3] sm:$0xff] }
  0x84   :  { %48 = vst [vmem:[#allocation3 + $0x9] sm:$0xff] %v46_v30 }
  0x8b   :  { %v50_v32 = vld [vmem:[#allocation3 + $0x8] sm:$0xff] }
  0x8c   :  { %v52_v33 = vld [vmem:[#allocation3 + $0xa] sm:$0xff]  ;;  %v51_v34 = vld [vmem:[#allocation3 + $0x2] sm:$0xff] }
  0x8d   :  { %v54_v35 = vmax.f32 %v50_v32, %v52_v33  ;;  %v53_v36 = vmax.f32 %v49_v31, %v51_v34 }
  0x8f   :  { %v56_v37 = vmax.f32 %v54_v35, %v46_v30  ;;  %v55_v38 = vmax.f32 %v53_v36, %v45_v21 }
  0x91   :  { %65 = vrot.lane.b32.xlu1 %v56_v37, %s290_s8  ;;  %63 = vrot.lane.b32.xlu0 %v55_v38, %s290_s8 }
  0x92   :  { %57 = vrot.lane.b32.xlu2 %v55_v38, %s291_s9 }
  0x9a   :  { %59 = vrot.lane.b32.xlu2 %v56_v37, %s291_s9 }
  0xec   :  { %v58_v39 = vpop.permute.xlu2 %57 }
  0xed   :  { %v61_v43 = vsel %vm330_vm1, %v58_v39, -inf }
  0xf4   :  { %v60_v40 = vpop.permute.xlu2 %59 }
  0xf5   :  { %v62_v44 = vsel %vm330_vm1, %v60_v40, -inf }
 0x103   :  { %v66_v41 = vpop.permute.xlu1 %65  ;;  %v64_v42 = vpop.permute.xlu0 %63 }
 0x104   :  { %v68_v45 = vsel %vm326_vm0, %v66_v41, -inf  ;;  %v67_v46 = vsel %vm326_vm0, %v64_v42, -inf }
 0x105   :  { %v70_v47 = vmax.f32 %v62_v44, %v68_v45  ;;  %v69_v48 = vmax.f32 %v61_v43, %v67_v46 }
 0x107   :  { %v72_v49 = vmax.f32 %v70_v47, %v56_v37  ;;  %v71_v50 = vmax.f32 %v69_v48, %v55_v38 }
 0x109   :  { %v74_v51 = vsub.f32 %v319_v1, %v72_v49  ;;  %v73_v52 = vsub.f32 %v309_v0, %v71_v50 }
 0x10b   :  { %v76_v53 = vmax.f32 %v74_v51, 0.0   ;;  %v75_v54 = vmax.f32 %v73_v52, 0.0  }
 0x10c LB: > { %s294_s12 = smov 127   ;;  %87 = vst [vmem:[#allocation2 + $0x1] sm:$0xff] %v284_v0  ;;  %s295_s13 = smov 1   ;;  %s288_s0 = sphi %s370_s0, %s82_s0   ;;  %v284_v0 = vphi %v309_v0, %v391_v0   ;;  %v280_v1 = vphi %v319_v1, %v402_v1   ;;  %v276_v54 = vphi %v75_v54, %v465_v54   ;;  %v272_v53 = vphi %v76_v53, %v464_v53  }
 0x10d   : > { %103 = vrot.lane.b32.xlu1 %v284_v0, %s294_s12  ;;  %97 = vrot.lane.b32.xlu0 %v284_v0, %s295_s13  ;;  %88 = vst [vmem:[#allocation2 + $0x9] sm:$0xff] %v280_v1  ;;  %s82_s0 = sadd.s32 1, %s288_s0  }
 0x10e   : > { %p79_p0 = scmp.ge.s32.totalorder %s82_s0, 40  }
 0x113   : > { %v89_v55 = vld [vmem:[#allocation2] sm:$0xff] }
 0x114   : > { %v91_v56 = vld [vmem:[#allocation2 + $0x2] sm:$0xff]  ;;  %v92_v2 = vld [vmem:[#allocation2 + $0xa] sm:$0xff] }
 0x115   : > { %105 = vrot.lane.b32.xlu1 %v280_v1, %s294_s12  ;;  %99 = vrot.lane.b32.xlu0 %v280_v1, %s295_s13  ;;  %v93_v57 = vmin.f32 %v89_v55, %v91_v56  ;;  %v90_v4 = vld [vmem:[#allocation2 + $0x8] sm:$0xff] }
 0x116   : > { %v94_v5 = vmin.f32 %v90_v4, %v92_v2 }
 0x117   : > { %v95_v62 = vmin.f32 %v93_v57, %v284_v0 }
 0x118   : > { %v96_v12 = vmin.f32 %v94_v5, %v280_v1 }
 0x17f   : > { %v104_v58 = vpop.permute.xlu1 %103  ;;  %v98_v59 = vpop.permute.xlu0 %97 }
 0x180   : > { %v107_v60 = vsel %vm326_vm0, %v104_v58, inf  ;;  %v101_v61 = vsel %vm330_vm1, %v98_v59, inf }
 0x181   : > { %v109_v63 = vmin.f32 %v101_v61, %v107_v60 }
 0x183   : > { %v111_v3 = vmin.f32 %v109_v63, %v284_v0 }
 0x185   : > { %v391_v0 = vmin.f32 %v95_v62, %v111_v3  }
 0x187   : > { %v106_v6 = vpop.permute.xlu1 %105  ;;  %v100_v7 = vpop.permute.xlu0 %99  ;;  %115 = vst [vmem:[#allocation2 + $0x1] sm:$0xff] %v391_v0  ;;  %131 = vrot.lane.b32.xlu0 %v391_v0, %s294_s12  ;;  %125 = vrot.lane.b32.xlu2 %v391_v0, %s295_s13 }
 0x188   : > { %v108_v8 = vsel %vm326_vm0, %v106_v6, inf  ;;  %v102_v11 = vsel %vm330_vm1, %v100_v7, inf }
 0x189   : > { %v110_v13 = vmin.f32 %v102_v11, %v108_v8 }
 0x18b   : > { %v112_v14 = vmin.f32 %v110_v13, %v280_v1 }
 0x18d   : > { %v402_v1 = vmin.f32 %v96_v12, %v112_v14  }
 0x18e   : > { %v117_v17 = vld [vmem:[#allocation2] sm:$0xff] }
 0x18f   : > { %116 = vst [vmem:[#allocation2 + $0x9] sm:$0xff] %v402_v1  ;;  %133 = vrot.lane.b32.xlu1 %v402_v1, %s294_s12  ;;  %127 = vrot.lane.b32.xlu2 %v402_v1, %s295_s13 }
 0x196   : > { %v119_v16 = vld [vmem:[#allocation2 + $0x2] sm:$0xff]  ;;  %v120_v26 = vld [vmem:[#allocation2 + $0xa] sm:$0xff] }
 0x197   : > { %v121_v19 = vmin.f32 %v117_v17, %v119_v16  ;;  %v118_v25 = vld [vmem:[#allocation2 + $0x8] sm:$0xff] }
 0x198   : > { %v122_v30 = vmin.f32 %v118_v25, %v120_v26 }
 0x199   : > { %v123_v23 = vmin.f32 %v121_v19, %v391_v0 }
 0x19a   : > { %v124_v34 = vmin.f32 %v122_v30, %v402_v1 }
 0x1e1   : > { %v126_v15 = vpop.permute.xlu2 %125 }
 0x1e2   : > { %v129_v20 = vsel %vm330_vm1, %v126_v15, inf }
 0x1e9   : > { %v128_v27 = vpop.permute.xlu2 %127 }
 0x1ea   : > { %v130_v31 = vsel %vm330_vm1, %v128_v27, inf }
 0x1f9   : > { %v132_v18 = vpop.permute.xlu0 %131 }
 0x1fa   : > { %v135_v21 = vsel %vm326_vm0, %v132_v18, inf }
 0x1fb   : > { %v137_v22 = vmin.f32 %v129_v20, %v135_v21 }
 0x1fd   : > { %v139_v24 = vmin.f32 %v137_v22, %v391_v0 }
 0x1ff   : > { %v141_v28 = vmin.f32 %v123_v23, %v139_v24 }
 0x201   : > { %143 = vst [vmem:[#allocation3 + $0x1] sm:$0xff] %v141_v28  ;;  %v134_v29 = vpop.permute.xlu1 %133 }
 0x202   : > { %v136_v32 = vsel %vm326_vm0, %v134_v29, inf }
 0x203   : > { %v138_v33 = vmin.f32 %v130_v31, %v136_v32 }
 0x205   : > { %v140_v35 = vmin.f32 %v138_v33, %v402_v1 }
 0x207   : > { %v142_v36 = vmin.f32 %v124_v34, %v140_v35 }
 0x208   : > { %v145_v37 = vld [vmem:[#allocation3] sm:$0xff] }
 0x209   : > { %144 = vst [vmem:[#allocation3 + $0x9] sm:$0xff] %v142_v36 }
 0x210   : > { %v147_v38 = vld [vmem:[#allocation3 + $0x2] sm:$0xff]  ;;  %v148_v40 = vld [vmem:[#allocation3 + $0xa] sm:$0xff] }
 0x211   : > { %v146_v39 = vld [vmem:[#allocation3 + $0x8] sm:$0xff]  ;;  %v149_v41 = vmax.f32 %v145_v37, %v147_v38 }
 0x212   : > { %v150_v42 = vmax.f32 %v146_v39, %v148_v40 }
 0x213   : > { %v151_v43 = vmax.f32 %v149_v41, %v141_v28 }
 0x214   : > { %v152_v44 = vmax.f32 %v150_v42, %v142_v36 }
 0x215   : > { %159 = vrot.lane.b32.xlu1 %v151_v43, %s294_s12  ;;  %153 = vrot.lane.b32.xlu2 %v151_v43, %s295_s13 }
 0x216   : > { %155 = vrot.lane.b32.xlu0 %v152_v44, %s295_s13 }
 0x21d   : > { %161 = vrot.lane.b32.xlu2 %v152_v44, %s294_s12 }
 0x26f   : > { %v154_v45 = vpop.permute.xlu2 %153 }
 0x270   : > { %v157_v48 = vsel %vm330_vm1, %v154_v45, -inf }
 0x277   : > { %v162_v46 = vpop.permute.xlu2 %161 }
 0x278   : > { %v164_v51 = vsel %vm326_vm0, %v162_v46, -inf }
 0x287   : > { %v160_v47 = vpop.permute.xlu1 %159 }
 0x288   : > { %v163_v49 = vsel %vm326_vm0, %v160_v47, -inf  ;;  %v156_v50 = vpop.permute.xlu0 %155 }
 0x289   : > { %v165_v52 = vmax.f32 %v157_v48, %v163_v49  ;;  %v158_v55 = vsel %vm330_vm1, %v156_v50, -inf }
 0x28a   : > { %v166_v56 = vmax.f32 %v158_v55, %v164_v51 }
 0x28b   : > { %v167_v57 = vmax.f32 %v165_v52, %v151_v43 }
 0x28c   : > { %v168_v58 = vmax.f32 %v166_v56, %v152_v44 }
 0x28d   : > { %v169_v59 = vsub.f32 %v391_v0, %v167_v57 }
 0x28e   : > { %v170_v60 = vsub.f32 %v402_v1, %v168_v58 }
 0x28f   : > { %v171_v61 = vmax.f32 %v169_v59, 0.0 }
 0x290   : > { %v172_v62 = vmax.f32 %v170_v60, 0.0 }
 0x291   : > { %v173_v63 = vmul.f32 %v276_v54, %v171_v61 }
 0x292   : > { %v174_v2 = vmul.f32 %v272_v53, %v172_v62 }
 0x293   : > { %v175_v3 = vsub.f32 %v171_v61, %v173_v63 }
 0x294   : > { %v176_v4 = vsub.f32 %v172_v62, %v174_v2 }
 0x295   : > { %v177_v5 = vmax.f32 %v175_v3, 0.0 }
 0x296   : > { %v178_v6 = vmax.f32 %v176_v4, 0.0  ;;  %81 = sbr.rel (!%p79_p0) target bundleno = 268 (0x10c), region = 31 }
 0x297   : > { %v179_v7 = vadd.f32 %v276_v54, %v177_v5  }
 0x298   : > { %v180_v8 = vadd.f32 %v272_v53, %v178_v6  }
 0x299   : > { %v465_v54 = vmov %v179_v7  ;;  %181 = vst [vmem:[%s459_s1] sm:$0xff] (%p79_p0), %v179_v7 }
 0x29a   : > { %v464_v53 = vmov %v180_v8  ;;  %182 = vst [vmem:[%s459_s1 + $0x8] sm:$0xff] (%p79_p0), %v180_v8 }

</bundles_post_ra>
